<compile_context>
chip_gen: v6e
topology: v6e:2x2x1
jax: 0.10.0
libtpu: 0.0.40
codegen_flags: <defaults>
</compile_context>

<pallas_src>
import functools
import math

import jax
import jax.numpy as jnp
from jax.experimental import pallas as pl
from jax.experimental.pallas import tpu as pltpu


_VMEM_LIMIT_BYTES = 48 * 1024 * 1024  # safe on v5e/v6e (128 MiB) and v7x (64 MiB)


def _compiler_params(dimension_semantics):
    return pltpu.CompilerParams(
        dimension_semantics=dimension_semantics,
        vmem_limit_bytes=_VMEM_LIMIT_BYTES,
    )


def _pick_tile(dim, pref, align):
    """Largest tile <= pref that is a multiple of `align` and divides `dim`.

    Falls back to the full dimension (always legal for a BlockSpec)."""
    if dim <= pref:
        return dim
    t = max(align, (pref // align) * align)
    while t >= align:
        if dim % t == 0:
            return t
        t -= align
    return dim


def _largest_divisor_leq(n, cap):
    cap = max(1, min(n, cap))
    for d in range(cap, 0, -1):
        if n % d == 0:
            return d
    return 1


# ----------------------------------------------------------------------------
# Tiled linear kernels (x @ W [+ b]) with f32 accumulation
# ----------------------------------------------------------------------------
def _linear_kernel(x_ref, w_ref, o_ref, acc_ref):
    @pl.when(pl.program_id(2) == 0)
    def _():
        acc_ref[...] = jnp.zeros_like(acc_ref)

    acc_ref[...] += jnp.dot(x_ref[...], w_ref[...],
                            preferred_element_type=jnp.float32)

    @pl.when(pl.program_id(2) == pl.num_programs(2) - 1)
    def _():
        o_ref[...] = acc_ref[...].astype(o_ref.dtype)


def _linear_bias_kernel(x_ref, w_ref, b_ref, o_ref, acc_ref):
    @pl.when(pl.program_id(2) == 0)
    def _():
        acc_ref[...] = jnp.zeros_like(acc_ref)

    acc_ref[...] += jnp.dot(x_ref[...], w_ref[...],
                            preferred_element_type=jnp.float32)

    @pl.when(pl.program_id(2) == pl.num_programs(2) - 1)
    def _():
        o_ref[...] = (acc_ref[...] + b_ref[...].astype(jnp.float32)
                      ).astype(o_ref.dtype)


def linear(x2d, w, b=None, *, tm=512, tn=256, tk=256):
    """x2d: (M, K), w: (K, N), optional b: (1, N) -> (M, N)."""
    M, K = x2d.shape
    Kw, N = w.shape
    assert K == Kw, f"linear: K mismatch {K} vs {Kw}"
    tm = _pick_tile(M, tm, 8)
    tn = _pick_tile(N, tn, 128)
    tk = _pick_tile(K, tk, 128)
    grid = (M // tm, N // tn, K // tk)

    x_spec = pl.BlockSpec((tm, tk), lambda i, j, k: (i, k))
    w_spec = pl.BlockSpec((tk, tn), lambda i, j, k: (k, j))
    o_spec = pl.BlockSpec((tm, tn), lambda i, j, k: (i, j))

    if b is None:
        kernel = _linear_kernel
        in_specs = [x_spec, w_spec]
        args = (x2d, w)
    else:
        kernel = _linear_bias_kernel
        in_specs = [x_spec, w_spec, pl.BlockSpec((1, tn), lambda i, j, k: (0, j))]
        args = (x2d, w, b)

    return pl.pallas_call(
        kernel,
        out_shape=jax.ShapeDtypeStruct((M, N), x2d.dtype),
        grid_spec=pltpu.PrefetchScalarGridSpec(
            num_scalar_prefetch=0,
            grid=grid,
            in_specs=in_specs,
            out_specs=o_spec,
            scratch_shapes=[pltpu.VMEM((tm, tn), jnp.float32)],
        ),
        compiler_params=_compiler_params(("parallel", "parallel", "arbitrary")),
    )(*args)


# ----------------------------------------------------------------------------
# Attention kernels
# ----------------------------------------------------------------------------
def _head_group(bh, dh):
    cap = max(1, 128 // dh) if dh < 128 else 1
    return _largest_divisor_leq(bh, min(8, cap))


def _flash_attn_kernel(q_ref, k_ref, v_ref, o_ref, m_sc, l_sc, acc_sc, *, scale):
    kv = pl.program_id(2)

    @pl.when(kv == 0)
    def _():
        m_sc[...] = jnp.full_like(m_sc, -jnp.inf)
        l_sc[...] = jnp.zeros_like(l_sc)
        acc_sc[...] = jnp.zeros_like(acc_sc)

    # Fold the softmax scale into q (Sq*Dh elementwise ops instead of Sq*Sk).
    q = q_ref[...] * scale
    # Contract last dims directly: no explicit transpose of k.
    s = jnp.einsum("gqd,gkd->gqk", q, k_ref[...],
                   preferred_element_type=jnp.float32)
    m_prev = m_sc[...]
    m_new = jnp.maximum(m_prev, s.max(axis=-1, keepdims=True))
    alpha = jnp.exp(m_prev - m_new)
    p = jnp.exp(s - m_new)
    l_sc[...] = alpha * l_sc[...] + p.sum(axis=-1, keepdims=True)
    acc_sc[...] = alpha * acc_sc[...] + jnp.einsum(
        "gqk,gkd->gqd", p.astype(v_ref.dtype), v_ref[...],
        preferred_element_type=jnp.float32)
    m_sc[...] = m_new

    @pl.when(kv == pl.num_programs(2) - 1)
    def _():
        o_ref[...] = (acc_sc[...] * pl.reciprocal(l_sc[...], approx=True)
                      ).astype(o_ref.dtype)


def flash_attention(q, k, v, scale, *, tq=256, tk=256, head_group=None):
    """Flash-style attention.  q: (BH, Sq, Dh), k/v: (BH, Sk, Dh) -> (BH, Sq, Dh).

    Never materializes the (Sq, Sk) probability tensor."""
    BH, Sq, Dh = q.shape
    Sk = k.shape[1]
    G = head_group if head_group is not None else _head_group(BH, Dh)
    tq = _pick_tile(Sq, tq, 8)
    tk = _pick_tile(Sk, tk, 8)
    kernel = functools.partial(_flash_attn_kernel, scale=scale)
    return pl.pallas_call(
        kernel,
        out_shape=jax.ShapeDtypeStruct((BH, Sq, Dh), q.dtype),
        grid_spec=pltpu.PrefetchScalarGridSpec(
            num_scalar_prefetch=0,
            grid=(BH // G, Sq // tq, Sk // tk),
            in_specs=[
                pl.BlockSpec((G, tq, Dh), lambda g, qi, ki: (g, qi, 0)),
                pl.BlockSpec((G, tk, Dh), lambda g, qi, ki: (g, ki, 0)),
                pl.BlockSpec((G, tk, Dh), lambda g, qi, ki: (g, ki, 0)),
            ],
            out_specs=pl.BlockSpec((G, tq, Dh), lambda g, qi, ki: (g, qi, 0)),
            scratch_shapes=[
                pltpu.VMEM((G, tq, 1), jnp.float32),
                pltpu.VMEM((G, tq, 1), jnp.float32),
                pltpu.VMEM((G, tq, Dh), jnp.float32),
            ],
        ),
        compiler_params=_compiler_params(("parallel", "parallel", "arbitrary")),
    )(q, k, v)


def _attn_probs_kernel(q_ref, k_ref, v_ref, o_ref, p_ref, *, scale):
    q = q_ref[...] * scale
    s = jnp.einsum("gqd,gkd->gqk", q, k_ref[...],
                   preferred_element_type=jnp.float32)
    m = jnp.max(s, axis=-1, keepdims=True)
    e = jnp.exp(s - m)
    denom = jnp.sum(e, axis=-1, keepdims=True)
    probs = e * pl.reciprocal(denom, approx=True)
    p_ref[...] = probs.astype(p_ref.dtype)
    o_ref[...] = jnp.einsum(
        "gqk,gkd->gqd", probs.astype(v_ref.dtype), v_ref[...],
        preferred_element_type=jnp.float32).astype(o_ref.dtype)


def attention_with_probs(q, k, v, scale, *, tq=256, head_group=None):
    """Attention that also returns the (BH, Sq, Sk) probability tensor
    (needed to match the PyTorch forward, which returns attention_probs)."""
    BH, Sq, Dh = q.shape
    Sk = k.shape[1]
    G = head_group if head_group is not None else _head_group(BH, Dh)
    tq = _pick_tile(Sq, tq, 8)
    kernel = functools.partial(_attn_probs_kernel, scale=scale)
    out, probs = pl.pallas_call(
        kernel,
        out_shape=(
            jax.ShapeDtypeStruct((BH, Sq, Dh), q.dtype),
            jax.ShapeDtypeStruct((BH, Sq, Sk), q.dtype),
        ),
        grid_spec=pltpu.PrefetchScalarGridSpec(
            num_scalar_prefetch=0,
            grid=(BH // G, Sq // tq),
            in_specs=[
                pl.BlockSpec((G, tq, Dh), lambda g, qi: (g, qi, 0)),
                pl.BlockSpec((G, Sk, Dh), lambda g, qi: (g, 0, 0)),
                pl.BlockSpec((G, Sk, Dh), lambda g, qi: (g, 0, 0)),
            ],
            out_specs=(
                pl.BlockSpec((G, tq, Dh), lambda g, qi: (g, qi, 0)),
                pl.BlockSpec((G, tq, Sk), lambda g, qi: (g, qi, 0)),
            ),
        ),
        compiler_params=_compiler_params(("parallel", "parallel")),
    )(q, k, v)
    return out, probs


# ----------------------------------------------------------------------------
# CrossAttention module (forward only), parameters created deterministically
# ----------------------------------------------------------------------------
class CrossAttentionPallas:
    def __init__(self, query_dim, cross_attention_dim=None, heads=8, dim_head=64,
                 dropout=0.0, bias=False, key=None):
        inner_dim = dim_head * heads
        cross_attention_dim = (cross_attention_dim if cross_attention_dim is not None
                               else query_dim)
        self.scale = dim_head ** (-0.5)
        self.heads = heads
        self.dim_head = dim_head
        self.query_dim = query_dim
        self.cross_attention_dim = cross_attention_dim
        self.inner_dim = inner_dim
        self.qkv_bias = bias

        if key is None:
            key = jax.random.PRNGKey(0)
        kq, kk, kv, ko, kb, kbq, kbk, kbv = jax.random.split(key, 8)

        def init_w(k, fan_in, fan_out):
            # PyTorch nn.Linear default: U(-1/sqrt(fan_in), 1/sqrt(fan_in)).
            bound = 1.0 / math.sqrt(fan_in)
            # stored pre-transposed as (fan_in, fan_out) so kernels do x @ W
            return jax.random.uniform(k, (fan_in, fan_out), jnp.float32,
                                      minval=-bound, maxval=bound)

        def init_b(k, fan_in, fan_out):
            bound = 1.0 / math.sqrt(fan_in)
            return jax.random.uniform(k, (1, fan_out), jnp.float32,
                                      minval=-bound, maxval=bound)

        self.w_q = init_w(kq, query_dim, inner_dim)
        self.w_k = init_w(kk, cross_attention_dim, inner_dim)
        self.w_v = init_w(kv, cross_attention_dim, inner_dim)
        self.w_out = init_w(ko, inner_dim, query_dim)
        self.b_out = init_b(kb, inner_dim, query_dim)
        if bias:
            self.b_q = init_b(kbq, query_dim, inner_dim)
            self.b_k = init_b(kbk, cross_attention_dim, inner_dim)
            self.b_v = init_b(kbv, cross_attention_dim, inner_dim)
        else:
            self.b_q = self.b_k = self.b_v = None

        # --- Pre-fused projection weights (built once, not per call) ---------
        # K and V always share the context input, so they can always be fused.
        self.w_kv = jnp.concatenate([self.w_k, self.w_v], axis=1)
        self.b_kv = (jnp.concatenate([self.b_k, self.b_v], axis=1)
                     if bias else None)
        # Q can only join the fusion when query_dim == cross_attention_dim
        # (the only configuration for which a self-attention call is valid).
        if query_dim == cross_attention_dim:
            self.w_qkv = jnp.concatenate([self.w_q, self.w_k, self.w_v], axis=1)
            self.b_qkv = (jnp.concatenate([self.b_q, self.b_k, self.b_v], axis=1)
                          if bias else None)
        else:
            self.w_qkv = None
            self.b_qkv = None
        # to_out[1] is Dropout(p=0.0) -> identity (eval semantics)

    def _reshape_heads_to_batch_dim(self, t):
        b, s, d = t.shape
        h = self.heads
        t = t.reshape(b, s, h, d // h).transpose(0, 2, 1, 3)
        return t.reshape(b * h, s, d // h)

    def _reshape_batch_dim_to_heads(self, t):
        bh, s, d = t.shape
        h = self.heads
        t = t.reshape(bh // h, h, s, d).transpose(0, 2, 1, 3)
        return t.reshape(bh // h, s, d * h)

    def __call__(self, hidden_states, context=None, mask=None,
                 return_attention_probs=True):
        # TODO(synk): `mask` is accepted but ignored — the reference forward()
        #             never applies it either.
        b, sq, _ = hidden_states.shape
        inner = self.inner_dim
        x2d = hidden_states.reshape(b * sq, -1)

        if context is None and self.w_qkv is not None:
            # Self-attention with matching dims: fuse q/k/v into a single
            # tiled matmul (one read of x instead of three).
            qkv = linear(x2d, self.w_qkv, self.b_qkv)             # (b*sq, 3*inner)
            sk = sq
            q3 = qkv[:, :inner].reshape(b, sq, inner)
            k3 = qkv[:, inner:2 * inner].reshape(b, sk, inner)
            v3 = qkv[:, 2 * inner:].reshape(b, sk, inner)
        else:
            ctx = context if context is not None else hidden_states
            sk = ctx.shape[1]
            c2d = ctx.reshape(b * sk, -1)
            assert c2d.shape[1] == self.cross_attention_dim, (
                "context channel count must equal cross_attention_dim")
            q3 = linear(x2d, self.w_q, self.b_q).reshape(b, sq, inner)
            # Fuse K and V (they share the context input).
            kv = linear(c2d, self.w_kv, self.b_kv)                # (b*sk, 2*inner)
            k3 = kv[:, :inner].reshape(b, sk, inner)
            v3 = kv[:, inner:].reshape(b, sk, inner)

        q = self._reshape_heads_to_batch_dim(q3)
        k = self._reshape_heads_to_batch_dim(k3)
        v = self._reshape_heads_to_batch_dim(v3)

        if return_attention_probs:
            attn_out, attn_probs = attention_with_probs(q, k, v, self.scale)
        else:
            # Fast path: flash attention, probs never written to HBM.
            attn_out = flash_attention(q, k, v, self.scale)
            attn_probs = None

        attn_out = self._reshape_batch_dim_to_heads(attn_out)
        # TODO(synk): the output projection could be fused into the attention
        #             kernel for a lane-dense store (Dh < 128 lanes); kept
        #             separate here for clarity.
        out = linear(attn_out.reshape(b * sq, -1), self.w_out, self.b_out)
        out = out.reshape(b, sq, self.query_dim)
        # to_out[1] is Dropout(0.0) -> identity
        return out, attn_probs


# ----------------------------------------------------------------------------
# Reference (plain jnp) for sanity checking
# ----------------------------------------------------------------------------
def reference_forward(mod, hidden_states, context=None):
    ctx = context if context is not None else hidden_states
    q = hidden_states @ mod.w_q + (mod.b_q if mod.qkv_bias else 0.0)
    k = ctx @ mod.w_k + (mod.b_k if mod.qkv_bias else 0.0)
    v = ctx @ mod.w_v + (mod.b_v if mod.qkv_bias else 0.0)
    q = mod._reshape_heads_to_batch_dim(q)
    k = mod._reshape_heads_to_batch_dim(k)
    v = mod._reshape_heads_to_batch_dim(v)
    scores = jnp.einsum("bid,bjd->bij", q, k) * mod.scale
    probs = jax.nn.softmax(scores, axis=-1)
    hs = jnp.einsum("bij,bjd->bid", probs, v)
    hs = mod._reshape_batch_dim_to_heads(hs)
    out = hs @ mod.w_out + mod.b_out
    return out, probs


if __name__ == "__main__":
    key = jax.random.PRNGKey(0)
    k_mod, k_mod_sa, k_x, k_ctx = jax.random.split(key, 4)

    batch = 2
    seq_q = 16
    seq_kv = 8
    query_dim = 32
    cross_attention_dim = 24
    heads = 4
    dim_head = 8

    # Cross-attention module (query_dim != cross_attention_dim).
    mod_cross = CrossAttentionPallas(
        query_dim=query_dim,
        cross_attention_dim=cross_attention_dim,
        heads=heads,
        dim_head=dim_head,
        dropout=0.0,
        bias=False,
        key=k_mod,
    )
    # Self-attention module (cross_attention_dim defaults to query_dim;
    # a self-attention call is only valid in this configuration).
    mod_self = CrossAttentionPallas(
        query_dim=query_dim,
        cross_attention_dim=None,
        heads=heads,
        dim_head=dim_head,
        dropout=0.0,
        bias=False,
        key=k_mod_sa,
    )

    hidden_states = jax.random.normal(k_x, (batch, seq_q, query_dim), jnp.float32)
    context = jax.random.normal(k_ctx, (batch, seq_kv, cross_attention_dim), jnp.float32)

    # Tolerances are slightly loose because softmax normalization uses the
    # EUP approximate reciprocal (pl.reciprocal(approx=True)).
    ATOL = 2e-3
    RTOL = 2e-3

    # 1) Cross-attention, default path (returns probs, matching PyTorch forward).
    out, probs = mod_cross(hidden_states, context)
    out, probs = jax.block_until_ready((out, probs))
    ref_out, ref_probs = reference_forward(mod_cross, hidden_states, context)
    assert out.shape == (batch, seq_q, query_dim)
    assert probs.shape == (batch * heads, seq_q, seq_kv)
    assert jnp.allclose(out, ref_out, atol=ATOL, rtol=RTOL)
    assert jnp.allclose(probs, ref_probs, atol=1e-3, rtol=RTOL)

    # 2) Self-attention, fast flash path (probs never materialized).
    out_sa, none_probs = mod_self(hidden_states, None, return_attention_probs=False)
    out_sa = jax.block_until_ready(out_sa)
    ref_sa_out, ref_sa_probs = reference_forward(mod_self, hidden_states, None)
    assert none_probs is None
    assert jnp.allclose(out_sa, ref_sa_out, atol=ATOL, rtol=RTOL)

    # 3) Self-attention with probs (exercises the fused QKV projection).
    out_sa2, probs_sa = mod_self(hidden_states, None)
    out_sa2, probs_sa = jax.block_until_ready((out_sa2, probs_sa))
    assert jnp.allclose(out_sa2, ref_sa_out, atol=ATOL, rtol=RTOL)
    assert jnp.allclose(probs_sa, ref_sa_probs, atol=1e-3, rtol=RTOL)

    print("KERNEL_OK")
</pallas_src>

<mosaic_0001>
module attributes {stable_mosaic.version = 11 : i64} {
  func.func @_linear_kernel(%arg0: i32, %arg1: i32, %arg2: i32, %arg3: memref<32x32xf32, #tpu.memory_space<vmem>>, %arg4: memref<32x32xf32, #tpu.memory_space<vmem>>, %arg5: memref<32x32xf32, #tpu.memory_space<vmem>>, %arg6: memref<32x32xf32, #tpu.memory_space<vmem>>) attributes {dimension_semantics = [#tpu.dimension_semantics<parallel>, #tpu.dimension_semantics<parallel>, #tpu.dimension_semantics<arbitrary>], iteration_bounds = array<i64: 1, 1, 1>, scalar_prefetch = 0 : i64, scratch_operands = 1 : i64, tpu.core_type = #tpu.core_type<tc>, window_params = [{transform_indices = @transform_0, window_bounds = array<i64: 32, 32>}, {transform_indices = @transform_1, window_bounds = array<i64: 32, 32>}, {transform_indices = @transform_2, window_bounds = array<i64: 32, 32>}]} {
    %c0_i32 = arith.constant 0 : i32
    %0 = arith.cmpi eq, %arg2, %c0_i32 : i32
    %1 = arith.extui %0 : i1 to i32
    %c0_i32_0 = arith.constant 0 : i32
    %2 = arith.cmpi ne, %1, %c0_i32_0 : i32
    scf.if %2 {
      %cst_10 = arith.constant 0.000000e+00 : f32
      %12 = vector.broadcast %cst_10 : f32 to vector<32x32xf32>
      %c0_11 = arith.constant 0 : index
      %c0_12 = arith.constant 0 : index
      %13 = vector.load %arg6[%c0_11, %c0_12] : memref<32x32xf32, #tpu.memory_space<vmem>>, vector<32x32xf32>
      tpu.vector_store %arg6[%c0_11, %c0_12], %12 {strides = array<i32>} : memref<32x32xf32, #tpu.memory_space<vmem>>, vector<32x32xf32>,
    } else {
    }
    %c0 = arith.constant 0 : index
    %c0_1 = arith.constant 0 : index
    %3 = vector.load %arg6[%c0, %c0_1] : memref<32x32xf32, #tpu.memory_space<vmem>>, vector<32x32xf32>
    %c0_2 = arith.constant 0 : index
    %c0_3 = arith.constant 0 : index
    %4 = vector.load %arg3[%c0_2, %c0_3] : memref<32x32xf32, #tpu.memory_space<vmem>>, vector<32x32xf32>
    %c0_4 = arith.constant 0 : index
    %c0_5 = arith.constant 0 : index
    %5 = vector.load %arg4[%c0_4, %c0_5] : memref<32x32xf32, #tpu.memory_space<vmem>>, vector<32x32xf32>
    %cst = arith.constant dense<0.000000e+00> : vector<32x32xf32>
    %6 = tpu.matmul %4, %5, %cst {dimension_numbers = #tpu.dot_dimension_numbers<[1], [0], [0], [1], [0, 0, 1, 1], [], []>} : vector<32x32xf32>, vector<32x32xf32>, vector<32x32xf32> -> vector<32x32xf32>
    %7 = arith.addf %3, %6 : vector<32x32xf32>
    %c0_6 = arith.constant 0 : index
    %c0_7 = arith.constant 0 : index
    %8 = vector.load %arg6[%c0_6, %c0_7] : memref<32x32xf32, #tpu.memory_space<vmem>>, vector<32x32xf32>
    tpu.vector_store %arg6[%c0_6, %c0_7], %7 {strides = array<i32>} : memref<32x32xf32, #tpu.memory_space<vmem>>, vector<32x32xf32>,
    %c0_i32_8 = arith.constant 0 : i32
    %9 = arith.cmpi eq, %arg2, %c0_i32_8 : i32
    %10 = arith.extui %9 : i1 to i32
    %c0_i32_9 = arith.constant 0 : i32
    %11 = arith.cmpi ne, %10, %c0_i32_9 : i32
    scf.if %11 {
      %c0_10 = arith.constant 0 : index
      %c0_11 = arith.constant 0 : index
      %12 = vector.load %arg6[%c0_10, %c0_11] : memref<32x32xf32, #tpu.memory_space<vmem>>, vector<32x32xf32>
      %c0_12 = arith.constant 0 : index
      %c0_13 = arith.constant 0 : index
      %13 = vector.load %arg5[%c0_12, %c0_13] : memref<32x32xf32, #tpu.memory_space<vmem>>, vector<32x32xf32>
      tpu.vector_store %arg5[%c0_12, %c0_13], %12 {strides = array<i32>} : memref<32x32xf32, #tpu.memory_space<vmem>>, vector<32x32xf32>,
    } else {
    }
    return
  }
  func.func @transform_0(%arg0: i32, %arg1: i32, %arg2: i32) -> (i32, i32) {
    %c0_i32 = arith.constant 0 : i32
    return %arg0, %arg2 : i32, i32
  }
  func.func @transform_1(%arg0: i32, %arg1: i32, %arg2: i32) -> (i32, i32) {
    %c0_i32 = arith.constant 0 : i32
    return %arg2, %arg1 : i32, i32
  }
  func.func @transform_2(%arg0: i32, %arg1: i32, %arg2: i32) -> (i32, i32) {
    %c0_i32 = arith.constant 0 : i32
    return %arg0, %arg1 : i32, i32
  }
}

</mosaic_0001>

<bundles_post_ra>
// kernel: tpu_custom_call.1
= control target key start
LH: loop header
LB: loop body
LE: loop exit
PB: predicated region body
PF: predicated region fallthrough
CT: control target
= control target key end

     0   :  { %7 = vsyncpa [#allocation4], 0  ;;  %s357_s0 = inlined_call_operand.hbm [shape: f32[32,32], index: 0, kind: input, shape index: {}]   ;;  %s358_s1 = inlined_call_operand.hbm [shape: f32[32,32], index: 1, kind: input, shape index: {}]   ;;  %s359_s2 = inlined_call_operand.hbm [shape: f32[32,32], index: 2, kind: output, shape index: {}]  }
   0x1   :  { %8 = vsyncpa [#allocation7], 0 }
   0x2   :  { %9 = vsyncpa [#allocation5], 0  ;;  %s302_s9 = smov [#allocation3]  }
   0x3   :  { %s15_s10 = sshll.u32 %s302_s9, 4  ;;  %s16_s10 = int_to_ptr.vmem [resolvable:$true] %s15_s10 }
   0x4   :  { %s244_s11 = scalar_lea.vmem %s16_s10, 512  ;;  %p249_p1 = scmp.lt.s32.totalorder %s16_s10, %s16_s10 }
   0x5   :  { %p245_p0 = scmp.ne.s32.totalorder %s16_s10, %s244_s11  ;;  %p250_p2 = scmp.lt.s32.totalorder %s244_s11, %s244_s11 }
   0x7   :  { %p251_p3 = por %p250_p2, %p249_p1 }
   0x9   :  { %p252_p4 = pnand %p251_p3, %p245_p0 }
   0xb   :  { %255 = shalt.err (!%p252_p4)
}
   0xc   :  { %s303_s12 = smov 128   ;;  %s304_s13 = smov 8  }
   0xd   :  { %21 = dma.hbm_to_vmem [thread:$0]  %s357_s0, 512, %s16_s10, [#allocation4], %s303_s12, %s303_s12, %s304_s13  }
   0xe   :  { %s305_s16 = smov [#allocation6]  }
   0xf   :  { %s27_s17 = sshll.u32 %s305_s16, 4  ;;  %s28_s17 = int_to_ptr.vmem [resolvable:$true] %s27_s17 }
  0x10   :  { %s264_s18 = scalar_lea.vmem %s28_s17, 512  ;;  %p269_p6 = scmp.lt.s32.totalorder %s28_s17, %s28_s17 }
  0x11   :  { %p265_p5 = scmp.ne.s32.totalorder %s28_s17, %s264_s18  ;;  %p270_p7 = scmp.lt.s32.totalorder %s264_s18, %s264_s18 }
  0x13   :  { %p271_p8 = por %p270_p7, %p269_p6 }
  0x15   :  { %p272_p9 = pnand %p271_p8, %p265_p5 }
  0x17   :  { %275 = shalt.err (!%p272_p9)
}
  0x18   :  { %33 = dma.hbm_to_vmem [thread:$0]  %s358_s1, 512, %s28_s17, [#allocation7], %s303_s12, %s303_s12, %s304_s13  }
  0x19   :  { %296 = dma.done.wait [#allocation4], 512  }
  0x1a   :  { %297 = vsyncadd [#allocation4], 4294966784 }
  0x1b   :  { %298 = dma.done.wait [#allocation7], 512  }
  0x1c   :  { %299 = vsyncadd [#allocation7], 4294966784  ;;  %vm44_vm0 = vcmask 261120   ;;  %v306_v0 = vmov 0.0   ;;  %v60_v1 = vld [vmem:[#allocation6 + $0x18] sm:$0xff]  ;;  %v59_v2 = vld [vmem:[#allocation6 + $0x10] sm:$0xff] }
  0x1d   :  { %46 = vst.msk [vmem:[#allocation2 + $0x8] sm:$0xff] %vm44_vm0, %v306_v0  ;;  %45 = vst.msk [vmem:[#allocation2] sm:$0xff] %vm44_vm0, %v306_v0  ;;  %208 = vmatprep.subr.mxu0 %v60_v1  ;;  %222 = vmatprep.subr.mxu1 %v60_v1  ;;  %v58_v3 = vld [vmem:[#allocation6 + $0x8] sm:$0xff]  ;;  %v57_v4 = vld [vmem:[#allocation6] sm:$0xff]  ;;  %s307_s0 = smov [#allocation8]  }
  0x1e   :  { %47 = vst.msk [vmem:[#allocation2 + $0x10] sm:$0xff] %vm44_vm0, %v306_v0  ;;  %48 = vst.msk [vmem:[#allocation2 + $0x18] sm:$0xff] %vm44_vm0, %v306_v0  ;;  %209 = vmatpush3.msra.mxu0 %v60_v1  ;;  %226 = vmatpush3.msra.mxu1 %v60_v1  ;;  %v53_v5 = vld [vmem:[#allocation3] sm:$0xff]  ;;  %v55_v6 = vld [vmem:[#allocation3 + $0x10] sm:$0xff]  ;;  %s183_s1 = sshll.u32 %s307_s0, 4  ;;  %s184_s1 = int_to_ptr.vmem [resolvable:$true] %s183_s1 }
  0x1f   :  { %210 = vmatprep.subr.mxu0 %v59_v2  ;;  %223 = vmatprep.subr.mxu1 %v59_v2  ;;  %v54_v7 = vld [vmem:[#allocation3 + $0x8] sm:$0xff]  ;;  %v56_v8 = vld [vmem:[#allocation3 + $0x18] sm:$0xff]  ;;  %s276_s21 = scalar_lea.vmem %s184_s1, 512  ;;  %p281_p11 = scmp.lt.s32.totalorder %s184_s1, %s184_s1 }
  0x20   :  { %211 = vmatpush3.msra.mxu0 %v59_v2  ;;  %227 = vmatpush3.msra.mxu1 %v59_v2  ;;  %p277_p10 = scmp.ne.s32.totalorder %s184_s1, %s276_s21  ;;  %p282_p12 = scmp.lt.s32.totalorder %s276_s21, %s276_s21 }
  0x21   :  { %212 = vmatprep.subr.mxu0 %v58_v3  ;;  %224 = vmatprep.subr.mxu1 %v58_v3 }
  0x22   :  { %213 = vmatpush3.msra.mxu0 %v58_v3  ;;  %228 = vmatpush3.msra.mxu1 %v58_v3  ;;  %p283_p13 = por %p282_p12, %p281_p11 }
  0x23   :  { %214 = vmatprep.subr.mxu0 %v57_v4  ;;  %225 = vmatprep.subr.mxu1 %v57_v4 }
  0x24   :  { %215 = vmatpush3.msra.mxu0 %v57_v4  ;;  %229 = vmatpush3.msra.mxu1 %v57_v4  ;;  %v50_v9 = vld [vmem:[#allocation2 + $0x8] sm:$0xff]  ;;  %v49_v13 = vld [vmem:[#allocation2] sm:$0xff]  ;;  %p284_p0 = pnand %p283_p13, %p277_p10 }
  0x25   :  { %216 = vmatprep.mubr.msk.f32.mxu0 %vm44_vm0, %v53_v5  ;;  %219 = vmatprep.mubr.msk.f32.mxu1 %vm44_vm0, %v55_v6  ;;  %v52_v10 = vld [vmem:[#allocation2 + $0x18] sm:$0xff]  ;;  %v51_v14 = vld [vmem:[#allocation2 + $0x10] sm:$0xff] }
  0x26   :  { %217 = vmatmul.mubr.msk.f32.vlgmr.msra.gmra.mxu0 %vm44_vm0, %v54_v7  ;;  %220 = vmatmul.mubr.msk.f32.vlgmr.msra.gmra.mxu1 %vm44_vm0, %v56_v8 }
  0xe6   :  { %v218_v11 = vpop.f32.mrf.mxu0  ;;  %v221_v12 = vpop.f32.mrf.mxu1 }
  0xe7   :  { %v160_v15 = vadd.f32 %v218_v11, %v50_v9  ;;  %v162_v16 = vadd.f32 %v221_v12, %v52_v10 }
  0xe8   :  { %v140_v17 = vpop.f32.mrf.mxu0  ;;  %v150_v18 = vpop.f32.mrf.mxu1 }
  0xe9   :  { %164 = vst.msk [vmem:[#allocation2 + $0x8] sm:$0xff] %vm44_vm0, %v160_v15  ;;  %166 = vst.msk [vmem:[#allocation2 + $0x18] sm:$0xff] %vm44_vm0, %v162_v16  ;;  %v159_v19 = vadd.f32 %v140_v17, %v49_v13  ;;  %v161_v20 = vadd.f32 %v150_v18, %v51_v14 }
  0xeb   :  { %163 = vst.msk [vmem:[#allocation2] sm:$0xff] %vm44_vm0, %v159_v19  ;;  %165 = vst.msk [vmem:[#allocation2 + $0x10] sm:$0xff] %vm44_vm0, %v161_v20 }
  0xf0   :  { %v171_v21 = vld [vmem:[#allocation2 + $0x8] sm:$0xff]  ;;  %v173_v22 = vld [vmem:[#allocation2 + $0x18] sm:$0xff] }
  0xf1   :  { %175 = vst.msk [vmem:[#allocation8 + $0x8] sm:$0xff] %vm44_vm0, %v171_v21  ;;  %177 = vst.msk [vmem:[#allocation8 + $0x18] sm:$0xff] %vm44_vm0, %v173_v22 }
  0xf2   :  { %v170_v23 = vld [vmem:[#allocation2] sm:$0xff]  ;;  %v172_v24 = vld [vmem:[#allocation2 + $0x10] sm:$0xff] }
  0xf3   :  { %174 = vst.msk [vmem:[#allocation8] sm:$0xff] %vm44_vm0, %v170_v23  ;;  %176 = vst.msk [vmem:[#allocation8 + $0x10] sm:$0xff] %vm44_vm0, %v172_v24 }
  0xf4   :  { %287 = shalt.err (!%p284_p0)
}
  0xf5   :  { %189 = dma.vmem_to_hbm [thread:$0]  %s184_s1, 512, %s359_s2, [#allocation5], %s303_s12, %s303_s12, %s304_s13  }
  0xf6   :  { %300 = dma.done.wait [#allocation5], 512  }
  0xf7   :  { %301 = vsyncadd [#allocation5], 4294966784 }
  0xf8   :  { %193 = vsyncpa [#allocation4], 1 }
  0xf9   :  { %194 = vsyncpa [#allocation7], 1 }
  0xfa   :  { %195 = vsyncpa [#allocation5], 1 }

</bundles_post_ra>
